<compile_context>
chip_gen: v7x
topology: tpu7x:2x2x1
jax: 0.10.0
libtpu: 0.0.40
codegen_flags: <defaults>
</compile_context>

<pallas_src>
import jax
import jax.numpy as jnp
from jax.experimental import pallas as pl
from jax.experimental.pallas import tpu as pltpu


def _normalize_kernel(mean_ref, inv_sd_ref, x_ref, o_ref):
    # mean_ref / inv_sd_ref: (R_pad, 1) f32, resident (constant block index).
    # x_ref / o_ref:         (rows, HW) blocks (o aliased onto x in HBM).
    rows = x_ref.shape[0]
    r0 = pl.multiple_of(pl.program_id(0) * rows, 8)
    mean = mean_ref[pl.ds(r0, rows), :]
    inv_sd = inv_sd_ref[pl.ds(r0, rows), :]
    o_ref[...] = ((x_ref[...] - mean) * inv_sd).astype(o_ref.dtype)


def _round_up(x, m):
    return ((x + m - 1) // m) * m


def _choose_rows_per_block(R, bytes_per_row, target_block_bytes):
    """Rows per grid block: a multiple of 8 (or the full R), sized to roughly
    target_block_bytes, and — for non-trivial inputs — yielding >= 2 grid steps
    with an even step count so v7x's two TensorCores stay balanced."""
    if R < 16:
        return R  # single full-extent block (tiny input)
    budget = max(8, (target_block_bytes // max(1, bytes_per_row)) // 8 * 8)
    # Never collapse to one step: cap at ceil(R/2) rounded up to the sublane tile.
    rpb = min(budget, _round_up(pl.cdiv(R, 2), 8))
    n = pl.cdiv(R, rpb)
    if n % 2 == 1:
        # Try shrinking the block so the step count becomes even (2-TC balance).
        rpb_alt = _round_up(pl.cdiv(R, n + 1), 8)
        if pl.cdiv(R, rpb_alt) % 2 == 0:
            rpb = rpb_alt
    return rpb


def make_normalize_layer(means, sds, *, target_block_bytes=6 << 20,
                         vmem_limit_bytes=48 << 20):
    """Returns fn(x) computing (x - means[c]) / sds[c] for NCHW float input.

    Channel constants (and the reciprocal of sds) are precomputed once here,
    hoisted out of the per-call path.
    """
    means_c = jnp.asarray(means, jnp.float32).reshape(-1)
    inv_sds_c = 1.0 / jnp.asarray(sds, jnp.float32).reshape(-1)

    def apply(x):
        B, C, H, W = x.shape
        HW = H * W
        R = B * C
        x2 = x.reshape(R, HW)

        bytes_per_row = HW * x.dtype.itemsize
        rows_per_block = _choose_rows_per_block(R, bytes_per_row, target_block_bytes)
        n_blocks = pl.cdiv(R, rows_per_block)
        R_pad = n_blocks * rows_per_block

        # Per-(b, c)-plane constants; padded so the in-kernel dynamic slice of
        # the resident constant block never goes OOB on a ragged last step.
        # (inv_sd padded with 1.0 to keep junk rows finite.)
        mean_rows = jnp.tile(means_c, B).reshape(R, 1)
        inv_rows = jnp.tile(inv_sds_c, B).reshape(R, 1)
        if R_pad != R:
            mean_rows = jnp.pad(mean_rows, ((0, R_pad - R), (0, 0)))
            inv_rows = jnp.pad(inv_rows, ((0, R_pad - R), (0, 0)),
                               constant_values=1.0)

        # Constants: constant block index -> stay resident in VMEM (one DMA).
        const_spec = pl.BlockSpec((R_pad, 1), lambda i: (0, 0))
        # x / out: full lane-dense rows. HW is a multiple of 128 for standard
        # image sizes; otherwise this remains correct (full-dim block) with
        # masked trailing stores.
        # TODO(synk): pad W to a multiple of 128 (or fuse into the consumer)
        # if non-128-multiple spatial sizes show up on the hot path.
        row_spec = pl.BlockSpec((rows_per_block, HW), lambda i: (i, 0))

        out2 = pl.pallas_call(
            _normalize_kernel,
            out_shape=jax.ShapeDtypeStruct((R, HW), x.dtype),
            grid=(n_blocks,),
            in_specs=[const_spec, const_spec, row_spec],
            out_specs=row_spec,
            # Operand 2 is x2: output overwrites it in place.
            input_output_aliases={2: 0},
            compiler_params=pltpu.CompilerParams(
                dimension_semantics=("parallel",),
                vmem_limit_bytes=vmem_limit_bytes,
            ),
        )(mean_rows, inv_rows, x2)

        return out2.reshape(B, C, H, W)

    return apply


if __name__ == "__main__":
    key = jax.random.PRNGKey(0)

    means = jnp.array([0.485, 0.456, 0.406, 0.5], dtype=jnp.float32)
    sds = jnp.array([0.229, 0.224, 0.225, 0.25], dtype=jnp.float32)
    normalize = jax.jit(make_normalize_layer(means, sds))

    # Case 1: small canonical shape (single block).
    B, C, H, W = 2, 4, 16, 16
    x = jax.random.normal(key, (B, C, H, W), dtype=jnp.float32)
    out = jax.block_until_ready(normalize(x))
    ref = (x - means[None, :, None, None]) / sds[None, :, None, None]
    assert out.shape == (B, C, H, W)
    assert jnp.allclose(out, ref, atol=1e-5, rtol=1e-5)

    # Case 2: ragged grid (R=20 rows split into 2 blocks of 16 -> last block
    # masked) to exercise the padded-constant / masked-writeback path.
    B2, C2, H2, W2 = 5, 4, 16, 24
    x2 = jax.random.normal(jax.random.PRNGKey(1), (B2, C2, H2, W2),
                           dtype=jnp.float32)
    out2 = jax.block_until_ready(normalize(x2))
    ref2 = (x2 - means[None, :, None, None]) / sds[None, :, None, None]
    assert out2.shape == (B2, C2, H2, W2)
    assert jnp.allclose(out2, ref2, atol=1e-5, rtol=1e-5)

    print("KERNEL_OK")
</pallas_src>

<mosaic_0001>
module attributes {stable_mosaic.version = 11 : i64} {
  func.func @_normalize_kernel(%arg0: i32, %arg1: memref<8x1xf32, #tpu.memory_space<vmem>>, %arg2: memref<8x1xf32, #tpu.memory_space<vmem>>, %arg3: memref<8x256xf32, #tpu.memory_space<vmem>>, %arg4: memref<8x256xf32, #tpu.memory_space<vmem>>) attributes {dimension_semantics = [#tpu.dimension_semantics<parallel>], iteration_bounds = array<i64: 1>, scalar_prefetch = 0 : i64, scratch_operands = 0 : i64, tpu.core_type = #tpu.core_type<tc>, window_params = [{pipeline_mode = #tpu.pipeline_mode<synchronous>, transform_indices = @transform_0, window_bounds = array<i64: 8, 1>}, {pipeline_mode = #tpu.pipeline_mode<synchronous>, transform_indices = @transform_1, window_bounds = array<i64: 8, 1>}, {transform_indices = @transform_2, window_bounds = array<i64: 8, 256>}, {transform_indices = @transform_3, window_bounds = array<i64: 8, 256>}]} {
    %c8_i32 = arith.constant 8 : i32
    %0 = arith.muli %arg0, %c8_i32 : i32
    %1 = tpu.assume_multiple %0, 8 : i32
    %2 = arith.index_cast %1 : i32 to index
    %c0 = arith.constant 0 : index
    %3 = vector.load %arg1[%2, %c0] : memref<8x1xf32, #tpu.memory_space<vmem>>, vector<8x1xf32>
    %4 = arith.index_cast %1 : i32 to index
    %c0_0 = arith.constant 0 : index
    %5 = vector.load %arg2[%4, %c0_0] : memref<8x1xf32, #tpu.memory_space<vmem>>, vector<8x1xf32>
    %c0_1 = arith.constant 0 : index
    %c0_2 = arith.constant 0 : index
    %6 = vector.load %arg3[%c0_1, %c0_2] : memref<8x256xf32, #tpu.memory_space<vmem>>, vector<8x256xf32>
    %7 = vector.broadcast %3 : vector<8x1xf32> to vector<8x256xf32>
    %8 = arith.subf %6, %7 : vector<8x256xf32>
    %9 = vector.broadcast %5 : vector<8x1xf32> to vector<8x256xf32>
    %10 = arith.mulf %8, %9 : vector<8x256xf32>
    %c0_3 = arith.constant 0 : index
    %c0_4 = arith.constant 0 : index
    %11 = vector.load %arg4[%c0_3, %c0_4] : memref<8x256xf32, #tpu.memory_space<vmem>>, vector<8x256xf32>
    tpu.vector_store %arg4[%c0_3, %c0_4], %10 {strides = array<i32>} : memref<8x256xf32, #tpu.memory_space<vmem>>, vector<8x256xf32>,
    return
  }
  func.func @transform_0(%arg0: i32) -> (i32, i32) {
    %c0_i32 = arith.constant 0 : i32
    %c0_i32_0 = arith.constant 0 : i32
    %c0_i32_1 = arith.constant 0 : i32
    return %c0_i32, %c0_i32_0 : i32, i32
  }
  func.func @transform_1(%arg0: i32) -> (i32, i32) {
    %c0_i32 = arith.constant 0 : i32
    %c0_i32_0 = arith.constant 0 : i32
    %c0_i32_1 = arith.constant 0 : i32
    return %c0_i32, %c0_i32_0 : i32, i32
  }
  func.func @transform_2(%arg0: i32) -> (i32, i32) {
    %c0_i32 = arith.constant 0 : i32
    %c0_i32_0 = arith.constant 0 : i32
    return %arg0, %c0_i32 : i32, i32
  }
  func.func @transform_3(%arg0: i32) -> (i32, i32) {
    %c0_i32 = arith.constant 0 : i32
    %c0_i32_0 = arith.constant 0 : i32
    return %arg0, %c0_i32 : i32, i32
  }
}

</mosaic_0001>

<bundles_post_ra>
// kernel: tile.14
= control target key start
LH: loop header
LB: loop body
LE: loop exit
PB: predicated region body
PF: predicated region fallthrough
CT: control target
= control target key end

     0   :  { %s22_s0 = inlined_call_operand.vmem [shape: f32[4], index: 0, kind: input, shape index: {}]   ;;  %s23_s1 = inlined_call_operand.vmem [shape: f32[2,4], index: 1, kind: output, shape index: {}]  }
   0x1   :  { %v4_v0 = vld [vmem:[%s22_s0] ss:$0 sm:$0xff] }
   0x2   :  { %5 = vst [vmem:[%s23_s1] sm:$0x3] %v4_v0 }

// kernel: tile.1
= control target key start
LH: loop header
LB: loop body
LE: loop exit
PB: predicated region body
PF: predicated region fallthrough
CT: control target
= control target key end

     0   :  { %s34_s8 = smov 125   ;;  %vm7_vm0 = vcmask 7168   ;;  %s35_s11 = smov 126   ;;  %s61_s0 = inlined_call_operand.vmem [shape: f32[2,4], index: 0, kind: input, shape index: {}]   ;;  %s62_s1 = inlined_call_operand.vmem [shape: f32[8,1], index: 1, kind: output, shape index: {}]  }
   0x1   :  { %v4_v0 = vld [vmem:[%s61_s0] sm:$0x3]  ;;  %s33_s0 = smov 127  }
   0x2   :  { %5 = vst [vmem:[#allocation0] sm:$0x3] %v4_v0 }
   0x9   :  { %v9_v1 = vld [vmem:[#allocation0] sm:$0x3]  }
   0xa   :  { %v21_v2 = vld [vmem:[#allocation0] sm:$0x3]   ;;  %10 = vrot.lane.b32.xlu0 %v9_v1, %s33_s0 }
   0xb   :  { %22 = vrot.lane.b32.xlu1 %v21_v2, %s34_s8  ;;  %v6_v3 = vld [vmem:[#allocation0] sm:$0x3]  }
   0xc   :  { %v15_v4 = vld [vmem:[#allocation0] sm:$0x3]   ;;  %8 = vst.msk [vmem:[%s62_s1] ss:$4 sm:$0x3] %vm7_vm0, %v6_v3  }
   0xe   :  { %16 = vrot.lane.b32.xlu0 %v15_v4, %s35_s11 }
  0x7c   :  { %v11_v5 = vpop.permute.xlu0 %10  }
  0x7d   :  { %v23_v6 = vpop.permute.xlu1 %22   ;;  %27 = vst.msk [vmem:[%s62_s1 + $0x1] ss:$4 sm:$0x3] %vm7_vm0, %v11_v5  }
  0x7e   :  { %29 = vst.msk [vmem:[%s62_s1 + $0x3] ss:$4 sm:$0x3] %vm7_vm0, %v23_v6  }
  0x80   :  { %v17_v7 = vpop.permute.xlu0 %16  }
  0x81   :  { %28 = vst.msk [vmem:[%s62_s1 + $0x2] ss:$4 sm:$0x3] %vm7_vm0, %v17_v7  }

// kernel: apply.1
= control target key start
LH: loop header
LB: loop body
LE: loop exit
PB: predicated region body
PF: predicated region fallthrough
CT: control target
= control target key end

     0   :  { %v43_v0 = vmov 0   ;;  %s82_s0 = inlined_call_operand.vmem [shape: f32[8,1], index: 0, kind: input, shape index: {}]   ;;  %s83_s1 = inlined_call_operand.vmem [shape: f32[8,1], index: 1, kind: input, shape index: {}]   ;;  %s84_s2 = inlined_call_operand.vmem [shape: f32[8,256], index: 2, kind: input, shape index: {}, may-alias: {2,3}]   ;;  %s85_s3 = inlined_call_operand.vmem [shape: f32[8,256], index: 3, kind: output, shape index: {}, may-alias: {2,3}]  }
   0x1   :  { %42 = vset.pattern.permute.xlu0 %v43_v0  ;;  %v16_v1 = vld [vmem:[%s82_s0] sm:$0xff]  ;;  %v20_v4 = vld [vmem:[%s84_s2 + $0x8] sm:$0xff] }
   0x2   :  { %23 = vperm.xlu0 %42, %v16_v1   ;;  %v18_v2 = vld [vmem:[%s83_s1] sm:$0xff] }
   0x3   :  { %v19_v3 = vld [vmem:[%s84_s2] sm:$0xff] }
   0x6   :  { %30 = vperm.xlu0 %42, %v18_v2  }
  0x81   :  { %v24_v5 = vpop.permute.xlu0 %23 }
  0x82   :  { %v26_v6 = vsub.f32 %v19_v3, %v24_v5  ;;  %v27_v7 = vsub.f32 %v20_v4, %v24_v5 }
  0x85   :  { %v31_v8 = vpop.permute.xlu0 %30 }
  0x86   :  { %v33_v9 = vmul.f32 %v31_v8, %v26_v6  ;;  %v34_v10 = vmul.f32 %v31_v8, %v27_v7 }
  0x88   :  { %35 = vst [vmem:[%s85_s3] sm:$0xff] %v33_v9  ;;  %36 = vst [vmem:[%s85_s3 + $0x8] sm:$0xff] %v34_v10 }

</bundles_post_ra>
